<compile_context>
chip_gen: v6e
topology: v6e:2x2x1
jax: 0.10.0
libtpu: 0.0.40
codegen_flags: <defaults>
</compile_context>

<pallas_src>
import functools

import jax
import jax.numpy as jnp
from jax.experimental import pallas as pl
from jax.experimental.pallas import tpu as pltpu


def _contrastive_bce_kernel(o1_ref, o2_ref, lbl_ref, bce_ref, *, inv_temp):
    o1 = o1_ref[...].astype(jnp.float32)        # (TB, D)
    o2 = o2_ref[...].astype(jnp.float32)        # (TB, D)
    y = lbl_ref[...].astype(jnp.float32)        # (TB, 1)

    # Fused normalization + cosine similarity: 3 lane-axis reductions per row.
    s1 = jnp.sum(o1 * o1, axis=1, keepdims=True)    # ||o1||^2
    s2 = jnp.sum(o2 * o2, axis=1, keepdims=True)    # ||o2||^2
    s12 = jnp.sum(o1 * o2, axis=1, keepdims=True)   # <o1, o2>

    # max(sqrt(s), 1e-12) == sqrt(max(s, 1e-24)); min(inv, 1e8) == 1 / max(., 1e-8)
    inv1 = jax.lax.rsqrt(jnp.maximum(s1, jnp.float32(1e-24)))
    inv2 = jax.lax.rsqrt(jnp.maximum(s2, jnp.float32(1e-24)))
    inv12 = jnp.minimum(inv1 * inv2, jnp.float32(1e8))

    sim = s12 * inv12 * jnp.float32(inv_temp)       # logits, (TB, 1)

    # Numerically stable BCE-with-logits: max(x,0) - x*y + log1p(exp(-|x|))
    bce_ref[...] = (jnp.maximum(sim, 0.0) - sim * y
                    + jnp.log1p(jnp.exp(-jnp.abs(sim))))


def _round_up(x, m):
    return ((x + m - 1) // m) * m


def contrastive_loss(output1, output2, label, temperature=0.2):
    """output1, output2: (B, D); label: (B,). Returns scalar float32 loss."""
    B, D = output1.shape
    itemsize = jnp.dtype(output1.dtype).itemsize

    # Row-tile size: keep (o1 + o2) x 2 pipeline buffers around <= 8 MiB so the
    # tile fits the default scoped-VMEM limit on v5e / v6e / v7x alike, while
    # still using large (up to 1024-row) tiles to amortize per-step overhead.
    vmem_budget = 8 * 1024 * 1024
    tb = vmem_budget // max(1, 4 * D * itemsize)
    tb = max(8, min(1024, (tb // 8) * 8))
    tb = min(tb, _round_up(B, 8))

    nt = pl.cdiv(B, tb)
    b_pad = nt * tb

    def pad_rows(x):
        return jnp.pad(x, ((0, b_pad - B), (0, 0))) if b_pad != B else x

    o1 = pad_rows(output1)
    o2 = pad_rows(output2)
    lbl = pad_rows(label.reshape(B, 1).astype(jnp.float32))

    kernel = functools.partial(_contrastive_bce_kernel,
                               inv_temp=float(1.0 / temperature))

    per_row_bce = pl.pallas_call(
        kernel,
        out_shape=jax.ShapeDtypeStruct((b_pad, 1), jnp.float32),
        grid=(nt,),
        in_specs=[
            pl.BlockSpec((tb, D), lambda i: (i, 0)),
            pl.BlockSpec((tb, D), lambda i: (i, 0)),
            pl.BlockSpec((tb, 1), lambda i: (i, 0)),
        ],
        out_specs=pl.BlockSpec((tb, 1), lambda i: (i, 0)),
        compiler_params=pltpu.CompilerParams(
            dimension_semantics=("parallel",)),
    )(o1, o2, lbl)

    # Mean over the real (unpadded) rows; 1/B folded into one scalar multiply.
    return jnp.sum(per_row_bce[:B, 0]) * jnp.float32(1.0 / B)


def _reference_loss(output1, output2, label, temperature=0.2):
    # Pure-JAX reference mirroring the PyTorch module semantics.
    o1 = output1.astype(jnp.float32)
    o2 = output2.astype(jnp.float32)
    x1 = o1 / jnp.maximum(jnp.linalg.norm(o1, axis=1, keepdims=True), 1e-12)
    x2 = o2 / jnp.maximum(jnp.linalg.norm(o2, axis=1, keepdims=True), 1e-12)
    dot = jnp.sum(x1 * x2, axis=1)
    denom = jnp.maximum(jnp.linalg.norm(x1, axis=1) * jnp.linalg.norm(x2, axis=1), 1e-8)
    sim = (dot / denom) / temperature
    y = label.astype(jnp.float32)
    bce = jnp.maximum(sim, 0.0) - sim * y + jnp.log1p(jnp.exp(-jnp.abs(sim)))
    return jnp.mean(bce)


if __name__ == "__main__":
    key = jax.random.PRNGKey(0)
    k1, k2, k3 = jax.random.split(key, 3)

    B, D = 8, 32  # small embedding batch consistent with the module's forward
    output1 = jax.random.normal(k1, (B, D), dtype=jnp.float32)
    output2 = jax.random.normal(k2, (B, D), dtype=jnp.float32)
    label = jax.random.bernoulli(k3, p=0.5, shape=(B,)).astype(jnp.float32)

    loss = contrastive_loss(output1, output2, label, temperature=0.2)
    loss = jax.block_until_ready(loss)

    ref = _reference_loss(output1, output2, label, temperature=0.2)
    assert jnp.allclose(loss, ref, rtol=1e-5, atol=1e-5), (loss, ref)

    print("KERNEL_OK")
</pallas_src>

<mosaic_0001>
module attributes {stable_mosaic.version = 11 : i64} {
  func.func @_contrastive_bce_kernel(%arg0: i32, %arg1: memref<8x32xf32, #tpu.memory_space<vmem>>, %arg2: memref<8x32xf32, #tpu.memory_space<vmem>>, %arg3: memref<8x1xf32, #tpu.memory_space<vmem>>, %arg4: memref<8x1xf32, #tpu.memory_space<vmem>>) attributes {dimension_semantics = [#tpu.dimension_semantics<parallel>], iteration_bounds = array<i64: 1>, scalar_prefetch = 0 : i64, scratch_operands = 0 : i64, tpu.core_type = #tpu.core_type<tc>, window_params = [{transform_indices = @transform_0, window_bounds = array<i64: 8, 32>}, {transform_indices = @transform_1, window_bounds = array<i64: 8, 32>}, {transform_indices = @transform_2, window_bounds = array<i64: 8, 1>}, {transform_indices = @transform_3, window_bounds = array<i64: 8, 1>}]} {
    %c0 = arith.constant 0 : index
    %c0_0 = arith.constant 0 : index
    %0 = vector.load %arg1[%c0, %c0_0] : memref<8x32xf32, #tpu.memory_space<vmem>>, vector<8x32xf32>
    %c0_1 = arith.constant 0 : index
    %c0_2 = arith.constant 0 : index
    %1 = vector.load %arg2[%c0_1, %c0_2] : memref<8x32xf32, #tpu.memory_space<vmem>>, vector<8x32xf32>
    %c0_3 = arith.constant 0 : index
    %c0_4 = arith.constant 0 : index
    %2 = vector.load %arg3[%c0_3, %c0_4] : memref<8x1xf32, #tpu.memory_space<vmem>>, vector<8x1xf32>
    %3 = arith.mulf %0, %0 : vector<8x32xf32>
    %cst = arith.constant dense<0.000000e+00> : vector<8xf32>
    %4 = vector.multi_reduction <add>, %3, %cst [1] : vector<8x32xf32> to vector<8xf32>
    %5 = vector.shape_cast %4 : vector<8xf32> to vector<8x1xf32>
    %6 = arith.mulf %1, %1 : vector<8x32xf32>
    %cst_5 = arith.constant dense<0.000000e+00> : vector<8xf32>
    %7 = vector.multi_reduction <add>, %6, %cst_5 [1] : vector<8x32xf32> to vector<8xf32>
    %8 = vector.shape_cast %7 : vector<8xf32> to vector<8x1xf32>
    %9 = arith.mulf %0, %1 : vector<8x32xf32>
    %cst_6 = arith.constant dense<0.000000e+00> : vector<8xf32>
    %10 = vector.multi_reduction <add>, %9, %cst_6 [1] : vector<8x32xf32> to vector<8xf32>
    %11 = vector.shape_cast %10 : vector<8xf32> to vector<8x1xf32>
    %cst_7 = arith.constant 1.000000e-24 : f32
    %12 = vector.broadcast %cst_7 : f32 to vector<8x1xf32>
    %13 = arith.maximumf %5, %12 : vector<8x1xf32>
    %14 = math.rsqrt %13 : vector<8x1xf32>
    %cst_8 = arith.constant 1.000000e-24 : f32
    %15 = vector.broadcast %cst_8 : f32 to vector<8x1xf32>
    %16 = arith.maximumf %8, %15 : vector<8x1xf32>
    %17 = math.rsqrt %16 : vector<8x1xf32>
    %18 = arith.mulf %14, %17 : vector<8x1xf32>
    %cst_9 = arith.constant 1.000000e+08 : f32
    %19 = vector.broadcast %cst_9 : f32 to vector<8x1xf32>
    %20 = arith.minimumf %18, %19 : vector<8x1xf32>
    %21 = arith.mulf %11, %20 : vector<8x1xf32>
    %cst_10 = arith.constant 5.000000e+00 : f32
    %22 = vector.broadcast %cst_10 : f32 to vector<8x1xf32>
    %23 = arith.mulf %21, %22 : vector<8x1xf32>
    %cst_11 = arith.constant 0.000000e+00 : f32
    %24 = vector.broadcast %cst_11 : f32 to vector<8x1xf32>
    %25 = arith.maximumf %23, %24 : vector<8x1xf32>
    %26 = arith.mulf %23, %2 : vector<8x1xf32>
    %27 = arith.subf %25, %26 : vector<8x1xf32>
    %28 = math.absf %23 : vector<8x1xf32>
    %cst_12 = arith.constant 0.000000e+00 : f32
    %29 = vector.broadcast %cst_12 : f32 to vector<8x1xf32>
    %30 = arith.subf %29, %28 : vector<8x1xf32>
    %31 = math.exp %30 : vector<8x1xf32>
    %32 = math.log1p %31 : vector<8x1xf32>
    %33 = arith.addf %27, %32 : vector<8x1xf32>
    %c0_13 = arith.constant 0 : index
    %c0_14 = arith.constant 0 : index
    %34 = vector.load %arg4[%c0_13, %c0_14] : memref<8x1xf32, #tpu.memory_space<vmem>>, vector<8x1xf32>
    tpu.vector_store %arg4[%c0_13, %c0_14], %33 {strides = array<i32>} : memref<8x1xf32, #tpu.memory_space<vmem>>, vector<8x1xf32>,
    return
  }
  func.func @transform_0(%arg0: i32) -> (i32, i32) {
    %c0_i32 = arith.constant 0 : i32
    %c0_i32_0 = arith.constant 0 : i32
    return %arg0, %c0_i32 : i32, i32
  }
  func.func @transform_1(%arg0: i32) -> (i32, i32) {
    %c0_i32 = arith.constant 0 : i32
    %c0_i32_0 = arith.constant 0 : i32
    return %arg0, %c0_i32 : i32, i32
  }
  func.func @transform_2(%arg0: i32) -> (i32, i32) {
    %c0_i32 = arith.constant 0 : i32
    %c0_i32_0 = arith.constant 0 : i32
    return %arg0, %c0_i32 : i32, i32
  }
  func.func @transform_3(%arg0: i32) -> (i32, i32) {
    %c0_i32 = arith.constant 0 : i32
    %c0_i32_0 = arith.constant 0 : i32
    return %arg0, %c0_i32 : i32, i32
  }
}

</mosaic_0001>

<bundles_post_ra>
// kernel: tpu_custom_call.1
= control target key start
LH: loop header
LB: loop body
LE: loop exit
PB: predicated region body
PF: predicated region fallthrough
CT: control target
= control target key end

     0   :  { %8 = vsyncpa [#allocation3], 0  ;;  %s105_s12 = smov [#allocation2]   ;;  %s138_s0 = inlined_call_operand.vmem [shape: f32[8,32], index: 0, kind: input, shape index: {}]   ;;  %s139_s1 = inlined_call_operand.hbm [shape: f32[8,32], index: 1, kind: input, shape index: {}]   ;;  %s140_s2 = inlined_call_operand.vmem [shape: f32[8,1], index: 2, kind: input, shape index: {}]   ;;  %s141_s3 = inlined_call_operand.vmem [shape: f32[8,1], index: 3, kind: output, shape index: {}]  }
   0x1   :  { %s17_s13 = sshll.u32 %s105_s12, 4  ;;  %s18_s13 = int_to_ptr.vmem [resolvable:$true] %s17_s13 }
   0x2   :  { %s91_s14 = scalar_lea.vmem %s18_s13, 128  ;;  %p96_p1 = scmp.lt.s32.totalorder %s18_s13, %s18_s13 }
   0x3   :  { %p92_p0 = scmp.ne.s32.totalorder %s18_s13, %s91_s14  ;;  %p97_p2 = scmp.lt.s32.totalorder %s91_s14, %s91_s14 }
   0x5   :  { %p98_p3 = por %p97_p2, %p96_p1 }
   0x7   :  { %p99_p4 = pnand %p98_p3, %p92_p0 }
   0x9   :  { %102 = shalt.err (!%p99_p4)
}
   0xa   :  { %20 = dma.hbm_to_vmem [thread:$0]  %s139_s1, 128, %s18_s13, [#allocation3]  }
   0xb   :  { %103 = dma.done.wait [#allocation3], 128  }
   0xc   :  { %104 = vsyncadd [#allocation3], 4294967168  ;;  %v26_v0 = vld [vmem:[%s138_s0] sm:$0xff]  ;;  %vm30_vm0 = vcmask 261120   ;;  %vm67_vm2 = vcmask 7168  }
   0xd   :  { %v27_v1 = vld [vmem:[#allocation2] sm:$0xff]  ;;  %v29_v2 = vmul.f32 %v26_v0, %v26_v0 }
   0xe   :  { %v34_v3 = vmul.f32 %v27_v1, %v27_v1  ;;  %v38_v4 = vmul.f32 %v27_v1, %v26_v0  ;;  %v28_v25 = vld [vmem:[%s140_s2] sm:$0xff] }
   0xf   :  { %v31_v5 = vsel %vm30_vm0, %v29_v2, 0.0 }
  0x10   :  { %v39_v6 = vsel %vm30_vm0, %v38_v4, 0.0  ;;  %32 = vadd.xlane.f32.xlu0 %v31_v5  ;;  %v35_v7 = vsel %vm30_vm0, %v34_v3, 0.0 }
  0x11   :  { %40 = vadd.xlane.f32.xlu1 %v39_v6 }
  0x14   :  { %36 = vadd.xlane.f32.xlu0 %v35_v7 }
  0x99   :  { %v33_v8 = vpop.xlane.xlu0 %32 }
  0x9a   :  { %v42_v9 = vmax.f32 %v33_v8, 1e-24  ;;  %v41_v15 = vpop.xlane.xlu1 %40 }
  0x9c   :  { %75 = vrsqrt.f32 %v42_v9 }
  0x9d   :  { %v37_v10 = vpop.xlane.xlu0 %36 }
  0x9e   :  { %v44_v11 = vmax.f32 %v37_v10, 1e-24 }
  0xa0   :  { %77 = vrsqrt.f32 %v44_v11 }
  0xa9   :  { %v76_v12 = vpop.eup %75 }
  0xad   :  { %v78_v13 = vpop.eup %77 }
  0xae   :  { %v46_v14 = vmul.f32 %v78_v13, %v76_v12 }
  0xb0   :  { %v47_v16 = vmin.f32 %v46_v14, 1e+08 }
  0xb2   :  { %v48_v17 = vmul.f32 %v47_v16, %v41_v15 }
  0xb4   :  { %v49_v18 = vmul.f32 5.0, %v48_v17 }
  0xb6   :  { %v53_v19 = vand.u32 2147483647, %v49_v18  ;;  %v50_v27 = vmax.f32 %v49_v18, 0.0  ;;  %v51_v28 = vmul.f32 %v49_v18, %v28_v25 }
  0xb8   :  { %v54_v20 = vsub.f32 0.0, %v53_v19  ;;  %v52_v33 = vsub.f32 %v50_v27, %v51_v28 }
  0xba   :  { %v55_v21 = vmul.f32 1.442695, %v54_v20 }
  0xbc   :  { %79 = vpow2.f32 %v55_v21 }
  0xc9   :  { %v80_v22 = vpop.eup %79 }
  0xca   :  { %v57_v23 = vadd.f32 1.0, %v80_v22  ;;  %v60_v24 = vmul.f32 -0.5, %v80_v22  ;;  %v63_v29 = vand.u32 2147483647, %v80_v22 }
  0xcc   :  { %81 = vlog2.f32 %v57_v23  ;;  %v61_v26 = vadd.f32 1.0, %v60_v24  ;;  %vm64_vm1 = vcmp.lt.f32.partialorder %v63_v29, 0.0004427343 }
  0xce   :  { %v62_v32 = vmul.f32 %v80_v22, %v61_v26 }
  0xd9   :  { %v82_v30 = vpop.eup %81 }
  0xda   :  { %v59_v31 = vmul.f32 0.6931472, %v82_v30 }
  0xdc   :  { %v65_v34 = vsel %vm64_vm1, %v62_v32, %v59_v31 }
  0xdd   :  { %v66_v35 = vadd.f32 %v65_v34, %v52_v33 }
  0xdf   :  { %68 = vst.msk [vmem:[%s141_s3] sm:$0xff] %vm67_vm2, %v66_v35 }
  0xe0   :  { %73 = vsyncpa [#allocation3], 1 }

</bundles_post_ra>
